<compile_context>
chip_gen: v7x
topology: tpu7x:2x2x1
jax: 0.10.0
libtpu: 0.0.40
codegen_flags: <defaults>
</compile_context>

<pallas_src>
import functools

import jax
import jax.numpy as jnp
from jax.experimental import pallas as pl
from jax.experimental.pallas import tpu as pltpu


# ----------------------------------------------------------------------------
# Kernel: fused (Linear -> Tanh) x num_layers on one lane-major batch tile.
# h: [features, tile_b] (batch on lanes); w: [out, in]; b: [out, 1].
# All layer params are tiny and fully resident in VMEM; the grid only tiles
# the batch (lane) dimension.
# ----------------------------------------------------------------------------
def _mlp_kernel(num_layers, x_ref, *refs):
    *param_refs, o_ref = refs
    h = x_ref[...].astype(jnp.float32)                 # [F, tile_b]
    for layer in range(num_layers):
        w = param_refs[2 * layer][...]                 # [out, in]
        b = param_refs[2 * layer + 1][...]             # [out, 1] -> lane bcast
        # Contraction dims (2 / 10) are tiny; the MXU push sits in the
        # vector-extended slot and is not the binding unit here, while the
        # tanh (EUP) runs on full 128-lane vregs.
        h = jnp.tanh(jnp.dot(w, h, preferred_element_type=jnp.float32) + b)
    o_ref[...] = h.astype(o_ref.dtype)                 # lane-dense store


def mlp_forward(x, params, *, tile_b=512):
    """x: [N, F] float32; params: list of (w [out,in], b [out]) per layer."""
    assert tile_b % 128 == 0, "tile_b must be a multiple of 128 (lane width)"
    n, f = x.shape
    num_layers = len(params)
    out_dim = params[-1][0].shape[0]

    # Transpose so batch is the lane axis; pad batch to a multiple of tile_b.
    n_pad = pl.cdiv(n, tile_b) * tile_b
    xt = x.T                                           # [F, N]
    if n_pad != n:
        xt = jnp.pad(xt, ((0, 0), (0, n_pad - n)))

    # Flatten params into kernel args; biases reshaped to [out, 1] columns.
    flat_args = []
    in_specs = [pl.BlockSpec((f, tile_b), lambda i: (0, i))]
    for (w, b) in params:
        b2 = b.reshape(-1, 1)
        flat_args.extend([w, b2])
        in_specs.append(pl.BlockSpec(w.shape, lambda i: (0, 0)))   # resident
        in_specs.append(pl.BlockSpec(b2.shape, lambda i: (0, 0)))  # resident

    kernel = functools.partial(_mlp_kernel, num_layers)

    out_t = pl.pallas_call(
        kernel,
        out_shape=jax.ShapeDtypeStruct((out_dim, n_pad), x.dtype),
        grid_spec=pltpu.PrefetchScalarGridSpec(
            num_scalar_prefetch=0,
            grid=(n_pad // tile_b,),
            in_specs=in_specs,
            out_specs=pl.BlockSpec((out_dim, tile_b), lambda i: (0, i)),
        ),
        compiler_params=pltpu.CompilerParams(
            dimension_semantics=("parallel",),   # batch steps shard across TCs
        ),
    )(xt, *flat_args)

    return out_t[:, :n].T                              # back to [N, out_dim]


# ----------------------------------------------------------------------------
# Deterministic parameter construction mirroring MLP.__init__
# (weights kept in PyTorch [out, in] convention).
# ----------------------------------------------------------------------------
def build_mlp_params(key, input_features=2, hidden_channels=10, shift_layers=1):
    if shift_layers > 1:
        dims = [input_features, hidden_channels]
        dims += [hidden_channels] * max(shift_layers - 2, 0)
        dims += [2]
    else:
        dims = [input_features, 2]

    params = []
    for d_in, d_out in zip(dims[:-1], dims[1:]):
        key, kw, kb = jax.random.split(key, 3)
        # xavier_normal std on the (out, in) PyTorch weight.
        std = (2.0 / (d_in + d_out)) ** 0.5
        w = jax.random.normal(kw, (d_out, d_in), dtype=jnp.float32) * std
        b = jax.random.normal(kb, (d_out,), dtype=jnp.float32) * 0.01
        params.append((w, b))
    return params


def mlp_reference(x, params):
    h = x
    for (w, b) in params:                              # w: [out, in]
        h = jnp.tanh(h @ w.T + b)
    return h


if __name__ == "__main__":
    key = jax.random.PRNGKey(0)
    key, kx = jax.random.split(key)

    # Small deterministic example: batch=200 (not a tile multiple, exercises
    # padding), input_features=2, hidden_channels=10, shift_layers=3
    # -> Linear(2,10)/Tanh, Linear(10,10)/Tanh, Linear(10,2)/Tanh.
    batch = 200
    input_features = 2
    hidden_channels = 10
    shift_layers = 3

    x = jax.random.normal(kx, (batch, input_features), dtype=jnp.float32)
    params = build_mlp_params(
        key,
        input_features=input_features,
        hidden_channels=hidden_channels,
        shift_layers=shift_layers,
    )

    # tile_b=128 keeps >=2 parallel grid steps at this small demo batch
    # (padded batch 256 -> 2 steps); real workloads should use the 512 default.
    out = mlp_forward(x, params, tile_b=128)
    out = jax.block_until_ready(out)

    ref = mlp_reference(x, params)
    assert out.shape == (batch, 2)
    assert jnp.allclose(out, ref, atol=1e-5, rtol=1e-5), "mismatch vs reference"

    print("KERNEL_OK")
</pallas_src>

<mosaic_0001>
module attributes {stable_mosaic.version = 11 : i64} {
  func.func @_mlp_kernel(%arg0: i32, %arg1: memref<2x128xf32, #tpu.memory_space<vmem>>, %arg2: memref<10x2xf32, #tpu.memory_space<vmem>>, %arg3: memref<10x1xf32, #tpu.memory_space<vmem>>, %arg4: memref<10x10xf32, #tpu.memory_space<vmem>>, %arg5: memref<10x1xf32, #tpu.memory_space<vmem>>, %arg6: memref<2x10xf32, #tpu.memory_space<vmem>>, %arg7: memref<2x1xf32, #tpu.memory_space<vmem>>, %arg8: memref<2x128xf32, #tpu.memory_space<vmem>>) attributes {dimension_semantics = [#tpu.dimension_semantics<parallel>], iteration_bounds = array<i64: 2>, scalar_prefetch = 0 : i64, scratch_operands = 0 : i64, tpu.core_type = #tpu.core_type<tc>, window_params = [{transform_indices = @transform_0, window_bounds = array<i64: 2, 128>}, {pipeline_mode = #tpu.pipeline_mode<synchronous>, transform_indices = @transform_1, window_bounds = array<i64: 10, 2>}, {pipeline_mode = #tpu.pipeline_mode<synchronous>, transform_indices = @transform_2, window_bounds = array<i64: 10, 1>}, {pipeline_mode = #tpu.pipeline_mode<synchronous>, transform_indices = @transform_3, window_bounds = array<i64: 10, 10>}, {pipeline_mode = #tpu.pipeline_mode<synchronous>, transform_indices = @transform_4, window_bounds = array<i64: 10, 1>}, {pipeline_mode = #tpu.pipeline_mode<synchronous>, transform_indices = @transform_5, window_bounds = array<i64: 2, 10>}, {pipeline_mode = #tpu.pipeline_mode<synchronous>, transform_indices = @transform_6, window_bounds = array<i64: 2, 1>}, {transform_indices = @transform_7, window_bounds = array<i64: 2, 128>}]} {
    %c0 = arith.constant 0 : index
    %c0_0 = arith.constant 0 : index
    %0 = vector.load %arg1[%c0, %c0_0] : memref<2x128xf32, #tpu.memory_space<vmem>>, vector<2x128xf32>
    %c0_1 = arith.constant 0 : index
    %c0_2 = arith.constant 0 : index
    %1 = vector.load %arg2[%c0_1, %c0_2] : memref<10x2xf32, #tpu.memory_space<vmem>>, vector<10x2xf32>
    %c0_3 = arith.constant 0 : index
    %c0_4 = arith.constant 0 : index
    %2 = vector.load %arg3[%c0_3, %c0_4] : memref<10x1xf32, #tpu.memory_space<vmem>>, vector<10x1xf32>
    %cst = arith.constant dense<0.000000e+00> : vector<10x128xf32>
    %3 = tpu.matmul %1, %0, %cst {dimension_numbers = #tpu.dot_dimension_numbers<[1], [0], [0], [1], [0, 0, 1, 1], [], []>} : vector<10x2xf32>, vector<2x128xf32>, vector<10x128xf32> -> vector<10x128xf32>
    %4 = vector.broadcast %2 : vector<10x1xf32> to vector<10x128xf32>
    %5 = arith.addf %3, %4 : vector<10x128xf32>
    %6 = math.tanh %5 : vector<10x128xf32>
    %c0_5 = arith.constant 0 : index
    %c0_6 = arith.constant 0 : index
    %7 = vector.load %arg4[%c0_5, %c0_6] : memref<10x10xf32, #tpu.memory_space<vmem>>, vector<10x10xf32>
    %c0_7 = arith.constant 0 : index
    %c0_8 = arith.constant 0 : index
    %8 = vector.load %arg5[%c0_7, %c0_8] : memref<10x1xf32, #tpu.memory_space<vmem>>, vector<10x1xf32>
    %cst_9 = arith.constant dense<0.000000e+00> : vector<10x128xf32>
    %9 = tpu.matmul %7, %6, %cst_9 {dimension_numbers = #tpu.dot_dimension_numbers<[1], [0], [0], [1], [0, 0, 1, 1], [], []>} : vector<10x10xf32>, vector<10x128xf32>, vector<10x128xf32> -> vector<10x128xf32>
    %10 = vector.broadcast %8 : vector<10x1xf32> to vector<10x128xf32>
    %11 = arith.addf %9, %10 : vector<10x128xf32>
    %12 = math.tanh %11 : vector<10x128xf32>
    %c0_10 = arith.constant 0 : index
    %c0_11 = arith.constant 0 : index
    %13 = vector.load %arg6[%c0_10, %c0_11] : memref<2x10xf32, #tpu.memory_space<vmem>>, vector<2x10xf32>
    %c0_12 = arith.constant 0 : index
    %c0_13 = arith.constant 0 : index
    %14 = vector.load %arg7[%c0_12, %c0_13] : memref<2x1xf32, #tpu.memory_space<vmem>>, vector<2x1xf32>
    %cst_14 = arith.constant dense<0.000000e+00> : vector<2x128xf32>
    %15 = tpu.matmul %13, %12, %cst_14 {dimension_numbers = #tpu.dot_dimension_numbers<[1], [0], [0], [1], [0, 0, 1, 1], [], []>} : vector<2x10xf32>, vector<10x128xf32>, vector<2x128xf32> -> vector<2x128xf32>
    %16 = vector.broadcast %14 : vector<2x1xf32> to vector<2x128xf32>
    %17 = arith.addf %15, %16 : vector<2x128xf32>
    %18 = math.tanh %17 : vector<2x128xf32>
    %c0_15 = arith.constant 0 : index
    %c0_16 = arith.constant 0 : index
    %19 = vector.load %arg8[%c0_15, %c0_16] : memref<2x128xf32, #tpu.memory_space<vmem>>, vector<2x128xf32>
    tpu.vector_store %arg8[%c0_15, %c0_16], %18 {strides = array<i32>} : memref<2x128xf32, #tpu.memory_space<vmem>>, vector<2x128xf32>,
    return
  }
  func.func @transform_0(%arg0: i32) -> (i32, i32) {
    %c0_i32 = arith.constant 0 : i32
    %c0_i32_0 = arith.constant 0 : i32
    return %c0_i32, %arg0 : i32, i32
  }
  func.func @transform_1(%arg0: i32) -> (i32, i32) {
    %c0_i32 = arith.constant 0 : i32
    %c0_i32_0 = arith.constant 0 : i32
    %c0_i32_1 = arith.constant 0 : i32
    return %c0_i32, %c0_i32_0 : i32, i32
  }
  func.func @transform_2(%arg0: i32) -> (i32, i32) {
    %c0_i32 = arith.constant 0 : i32
    %c0_i32_0 = arith.constant 0 : i32
    %c0_i32_1 = arith.constant 0 : i32
    return %c0_i32, %c0_i32_0 : i32, i32
  }
  func.func @transform_3(%arg0: i32) -> (i32, i32) {
    %c0_i32 = arith.constant 0 : i32
    %c0_i32_0 = arith.constant 0 : i32
    %c0_i32_1 = arith.constant 0 : i32
    return %c0_i32, %c0_i32_0 : i32, i32
  }
  func.func @transform_4(%arg0: i32) -> (i32, i32) {
    %c0_i32 = arith.constant 0 : i32
    %c0_i32_0 = arith.constant 0 : i32
    %c0_i32_1 = arith.constant 0 : i32
    return %c0_i32, %c0_i32_0 : i32, i32
  }
  func.func @transform_5(%arg0: i32) -> (i32, i32) {
    %c0_i32 = arith.constant 0 : i32
    %c0_i32_0 = arith.constant 0 : i32
    %c0_i32_1 = arith.constant 0 : i32
    return %c0_i32, %c0_i32_0 : i32, i32
  }
  func.func @transform_6(%arg0: i32) -> (i32, i32) {
    %c0_i32 = arith.constant 0 : i32
    %c0_i32_0 = arith.constant 0 : i32
    %c0_i32_1 = arith.constant 0 : i32
    return %c0_i32, %c0_i32_0 : i32, i32
  }
  func.func @transform_7(%arg0: i32) -> (i32, i32) {
    %c0_i32 = arith.constant 0 : i32
    %c0_i32_0 = arith.constant 0 : i32
    return %c0_i32, %arg0 : i32, i32
  }
}

</mosaic_0001>

<bundles_post_ra>
// kernel: tpu_custom_call.1
= control target key start
LH: loop header
LB: loop body
LE: loop exit
PB: predicated region body
PF: predicated region fallthrough
CT: control target
= control target key end

     0   :  { %12 = vsyncpa [#allocation3], 0  ;;  %s1007_s0 = inlined_call_operand.vmem [shape: f32[2,256], index: 0, kind: input, shape index: {}]   ;;  %s1008_s1 = inlined_call_operand.vmem [shape: f32[10,2], index: 1, kind: input, shape index: {}]   ;;  %s1009_s2 = inlined_call_operand.vmem [shape: f32[10,1], index: 2, kind: input, shape index: {}]   ;;  %s1010_s3 = inlined_call_operand.vmem [shape: f32[10,10], index: 3, kind: input, shape index: {}]   ;;  %s1011_s4 = inlined_call_operand.vmem [shape: f32[10,1], index: 4, kind: input, shape index: {}]   ;;  %s1012_s5 = inlined_call_operand.vmem [shape: f32[2,10], index: 5, kind: input, shape index: {}]   ;;  %s1013_s6 = inlined_call_operand.vmem [shape: f32[2,1], index: 6, kind: input, shape index: {}]   ;;  %s1014_s7 = inlined_call_operand.hbm [shape: f32[2,256], index: 7, kind: output, shape index: {}]  }
   0x1   :  { %14 = vsyncpa [#allocation3 + $0x1], 0  ;;  %s859_s24 = smov 0   ;;  %s861_s25 = smov 0  }
   0x2   :  { %s863_s26 = smov 0   ;;  %s865_s27 = smov 0  }
   0x3 LB: > { %s880_s28 = sadd.s32 4294967295, %s811_s27   ;;  %s636_s29 = sadd.s32 4294967294, %s811_s27   ;;  %s811_s27 = sphi %s865_s27, %s1022_s27   ;;  %s807_s26 = sphi %s863_s26, %s1021_s26   ;;  %s803_s25 = sphi %s861_s25, %s1020_s25   ;;  %s799_s24 = sphi %s859_s24, %s1019_s24  }
   0x4   : > { %s884_s30 = sadd.s32 1, %s811_s27   ;;  %s179_s8 = sadd.s32 1, %s807_s26 }
   0x5   : > { %s176_s9 = ssub.s32 %s811_s27, %s884_s30  ;;  %p189_p0 = scmp.ne.s32.totalorder %s807_s26, %s803_s25 }
   0x6   : > { %p177_p1 = scmp.eq.s32.totalorder %s176_s9, 0  ;;  %p190_p2 = scmp.eq.s32.totalorder %s880_s28, 1 }
   0x7   : > { %p195_p3 = scmp.ne.s32.totalorder %s803_s25, %s799_s24  ;;  %p196_p4 = scmp.eq.s32.totalorder %s636_s29, 1 }
   0x8   : > { %s895_s10 = scalar_select %p177_p1, %s807_s26, %s179_s8  }
   0x9   : > { %p897_p5 = por %p190_p2, %p189_p0  ;;  %p901_p6 = por %p196_p4, %p195_p3 }
   0xa   : > { %p639_p7 = scmp.ge.s32.totalorder %s811_s27, 1  ;;  %p239_p8 = scmp.lt.s32.totalorder %s811_s27, 3 }
   0xc   : > { %p240_p9 = pnand %p639_p7, %p239_p8 }
   0xd   : > { %p270_p10 = scmp.lt.s32.totalorder (!%p240_p9), %s880_s28, 1  ;;  %v275_v0 = vld [vmem:[%s1008_s1] sm:$0xff] (!%p240_p9)  ;;  %vm289_vm0 = vcmask (!%p240_p9), 15360   ;;  %v813_v2 = vmov (!%p240_p9), 0   ;;  %vm296_vm1 = vcmask (!%p240_p9), 1041408   ;;  %vm391_vm2 = vcmask (!%p240_p9), 80896  }
   0xe   : > { %243 = sbr.rel (%p240_p9) target bundleno = 730 (0x2da), region = 48  ;;  %666 = vmatprep.mubr.msk.f32.mxu0 (!%p240_p9), %vm289_vm0, %v275_v0  ;;  %v277_v1 = vld [vmem:[%s1009_s2] sm:$0xff] (!%p240_p9)  ;;  %737 = vset.pattern.permute.xlu0 (!%p240_p9), %v813_v2  ;;  %v278_v3 = vld [vmem:[%s1009_s2 + $0x8] sm:$0x3] (!%p240_p9)  ;;  %vm814_vm3 = vmmov (!%p240_p9), 1   ;;  %v815_v21 = vmov (!%p240_p9), 0.0|0.0  }
   0xf   : > { %738 = vset.pattern.permute.xlu1 (!%p240_p9), %v813_v2  ;;  %281 = vperm.xlu0 (!%p240_p9), %737, %v277_v1   ;;  %v276_v5 = vld [vmem:[%s1008_s1 + $0x8] sm:$0x3] (!%p240_p9)  ;;  %v479_v6 = vld [vmem:[%s1013_s6] sm:$0x3] (!%p240_p9)  ;;  %vm942_vm4 = vmpackc.low (!%p240_p9), %vm296_vm1, %vm814_vm3  ;;  %vm816_vm5 = vmmov (!%p240_p9), 0   ;;  %v817_v22 = vmov (!%p240_p9), 0.0  }
  0x10   : > { %v377_v7 = vld [vmem:[%s1010_s3] sm:$0xff] (!%p240_p9)  ;;  %v380_v9 = vld [vmem:[%s1011_s4 + $0x8] sm:$0x3] (!%p240_p9)  ;;  %s267_s29 = sand.u32 (!%p240_p9), 1, %s803_s25   ;;  %s651_s9 = sshll.u32 (!%p240_p9), %s880_s28, 5 }
  0x11   : > { %673 = vmatprep.mubr.msk.f32.mxu1 (!%p240_p9), %vm391_vm2, %v377_v7  ;;  %v379_v8 = vld [vmem:[%s1011_s4] sm:$0xff] (!%p240_p9)  ;;  %v378_v20 = vld [vmem:[%s1010_s3 + $0x8] sm:$0x3] (!%p240_p9)  ;;  %s640_s8 = sshll.u32 (!%p240_p9), %s267_s29, 1 }
  0x12   : > { %383 = vperm.xlu1 (!%p240_p9), %738, %v379_v8   ;;  %v478_v32 = vld [vmem:[%s1012_s5] sm:$0x3] (!%p240_p9)  ;;  %s269_s13 = scalar_lea.vmem (!%p240_p9), [#allocation2], %s640_s8 }
  0x13   : > { %286 = vperm.xlu0 (!%p240_p9), %737, %v278_v3   ;;  %s577_s14 = sshll.u32 (!%p240_p9), %s269_s13, 4  ;;  %s967_s14 = int_to_ptr.vmem [resolvable:$true] %s577_s14 }
  0x14   : > { %s749_s19 = scalar_lea.vmem (!%p240_p9), %s967_s14, 32 }
  0x15   : > { %s271_s17 = scalar_select %p270_p10, %s880_s28, 1 }
  0x16   : > { %388 = vperm.xlu1 %738, %v380_v9   ;;  %p750_p11 = scmp.ne.s32.totalorder %s967_s14, %s749_s19  ;;  %s818_s28 = smov [#allocation2]  }
  0x17   : > { %s641_s18 = sshll.u32 %s271_s17, 1  ;;  %482 = vperm.xlu0 %737, %v479_v6   ;;  %s965_s17 = scalar_lea.hbm %s1014_s7, %s651_s9 }
  0x18   : > { %s273_s23 = scalar_lea.vmem %s1007_s0, %s641_s18  ;;  %s564_s18 = scalar_lea.sflag [#allocation3], %s267_s29 }
  0x19   : > { %v274_v4 = vld [vmem:[%s273_s23] sm:$0x3]  ;;  %p751_p12 = pnand %p750_p11, %p897_p5  ;;  %s753_s20 = sshll.u32 %s818_s28, 4  ;;  %s754_s20 = int_to_ptr.vmem [resolvable:$false] %s753_s20 }
  0x1a   : > { %664 = vmatprep.subr.msk.mxu0 %vm296_vm1, %v274_v4  ;;  %s755_s21 = scalar_lea.vmem %s754_s20, 64  ;;  %p756_p0 = scmp.lt.s32.totalorder %s967_s14, %s754_s20 }
  0x1b   : > { %665 = vmatpush3.msk.msra.mxu0 %vm296_vm1, %v274_v4  ;;  %p752_p13 = pneg %p751_p12  ;;  %p757_p1 = scmp.lt.s32.totalorder %s755_s21, %s749_s19 }
  0x1c   : > { %667 = vmatmul.mubr.msk.f32.vlgmr.msra.gmra.mrb[0].mxu0 %vm289_vm0, %v276_v5  ;;  %689 = vmatprep.subr.bf16.mxu0 %v815_v21 }
  0x1d   : > { %680 = vmatprep.mubr.msk.f32.mxu0 %vm816_vm5, %v817_v22  ;;  %p758_p2 = por %p757_p1, %p756_p0 }
  0x1f   : > { %p759_p3 = pnand %p758_p2, %p752_p13 }
  0x8e   : > { %v282_v10 = vpop.permute.xlu0 %281 }
  0x91   : > { %v384_v23 = vpop.permute.xlu1 %383 }
  0x92   : > { %v287_v11 = vpop.permute.xlu0 %286 }
  0x95   : > { %v389_v24 = vpop.permute.xlu1 %388 }
  0x96   : > { %v483_v33 = vpop.permute.xlu0 %482 }
  0xef   : > { %v668_v12 = vpop.f32.mrb[0].mxu0 }
  0xf0   : > { %v372_v13 = vadd.f32 %v668_v12, %v287_v11  ;;  %v366_v14 = vpop.f32.mrb[1].mxu0 }
  0xf1   : > { %v367_v15 = vadd.f32 %v366_v14, %v282_v10 }
  0xf2   : > { %739 = vtanh.f32 %v372_v13 }
  0xf3   : > { %741 = vtanh.f32 %v367_v15 }
  0xfc   : > { %v740_v16 = vpop.eup %739 }
  0xfd   : > { %v742_v17 = vpop.eup %741 }
  0xfe   : > { %v683_v19 = vpack.c.bf16 %v740_v16, %v742_v17 }
 0x100   : > { %685 = vmatprep.subr.msk.bf16.mxu1 %vm942_vm4, %v683_v19 }
 0x101   : > { %688 = vmatpush3.bf16.msk.msra.mxu1 %vm942_vm4, %v683_v19 }
 0x104   : > { %674 = vmatmul.mubr.msk.f32.vlgmr.msra.gmra.mrb[0].mxu1 %vm391_vm2, %v378_v20 }
 0x1d7   : > { %v675_v25 = vpop.f32.mrb[0].mxu1 }
 0x1d8   : > { %v473_v26 = vadd.f32 %v675_v25, %v389_v24  ;;  %v467_v27 = vpop.f32.mrb[1].mxu1 }
 0x1d9   : > { %v468_v28 = vadd.f32 %v467_v27, %v384_v23 }
 0x1da   : > { %743 = vtanh.f32 %v473_v26 }
 0x1db   : > { %745 = vtanh.f32 %v468_v28 }
 0x1e4   : > { %v744_v29 = vpop.eup %743 }
 0x1e5   : > { %v746_v30 = vpop.eup %745 }
 0x1e6   : > { %v690_v31 = vpack.c.bf16 %v744_v29, %v746_v30 }
 0x1e8   : > { %692 = vmatpush3.bf16.msk.msra.mxu0 %vm942_vm4, %v690_v31 }
 0x1eb   : > { %681 = vmatmul.mubr.msk.f32.vlgmr.msra.gmra.mrb[2].mxu0 %vm391_vm2, %v478_v32 }
 0x2be   : > { %v557_v34 = vpop.f32.mrb[2].mxu0 }
 0x2bf   : > { %v558_v35 = vadd.f32 %v557_v34, %v483_v33  ;;  %v682_v36 = vpop.f32.mrb[3].mxu0 }
 0x2c1   : > { %747 = vtanh.f32 %v558_v35 }
 0x2cb   : > { %v748_v37 = vpop.eup %747 }
 0x2cc   : > { %562 = vst [vmem:[%s269_s13] sm:$0x3] %v748_v37 }
 0x2cd   : > { %762 = shalt.err (!%p759_p3)
}
 0x2ce   : > { %s763_s22 = scalar_lea.hbm %s965_s17, 32  ;;  %s767_s8 = scalar_lea.hbm %s1014_s7, 64 }
 0x2cf   : > { %p764_p4 = scmp.ne.s32.totalorder %s965_s17, %s763_s22  ;;  %p768_p9 = scmp.lt.u32.totalorder %s965_s17, %s1014_s7 }
 0x2d0   : > { %p769_p10 = scmp.lt.u32.totalorder %s767_s8, %s763_s22  ;;  %p771_p12 = scmp.lt.u32.totalorder %s763_s22, %s965_s17 }
 0x2d1   : > { %p765_p7 = pnand %p764_p4, %p897_p5 }
 0x2d2   : > { %p770_p11 = por %p769_p10, %p768_p9 }
 0x2d3   : > { %p766_p8 = pneg %p765_p7 }
 0x2d4   : > { %p772_p13 = por %p771_p12, %p770_p11 }
 0x2d6   : > { %p773_p0 = pnand %p772_p13, %p766_p8 }
 0x2d8   : > { %776 = shalt.err (!%p773_p0)
}
 0x2d9   : > { %693 = dma.vmem_to_hbm [thread:$0]  (%p897_p5), %s967_s14, 32, %s965_s17, %s564_s18  }
 0x2da PF: > { %p699_p1 = scmp.ge.s32.totalorder %s811_s27, 2  ;;  %s589_s15 = sand.u32 1, %s799_s24  }
 0x2db   : > { %s590_s16 = scalar_lea.sflag [#allocation3], %s589_s15 }
 0x2dc   : > { %p696_p2 = pnand %p699_p1, %p901_p6 }
 0x2de   : > { %794 = dma.done.wait (!%p696_p2), %s590_s16, 32  }
 0x2df   : > { %796 = vsyncadd (!%p696_p2), %s590_s16, 4294967264  ;;  %p17_p3 = scmp.ge.s32.totalorder %s884_s30, 4   ;;  %s1019_s24 = smov %s803_s25 }
 0x2e0   : > { %s1020_s25 = smov %s807_s26  ;;  %s1021_s26 = smov %s895_s10 }
 0x2e1   : > { %s1022_s27 = smov %s884_s30  ;;  %19 = sbr.rel (!%p17_p3) target bundleno = 3 (0x3), region = 83 }
 0x2e8   :  { %595 = vsyncpa [#allocation3], 1 }
 0x2e9   :  { %597 = vsyncpa [#allocation3 + $0x1], 1 }

</bundles_post_ra>
